<compile_context>
chip_gen: v7x
topology: tpu7x:2x2x1
jax: 0.10.0
libtpu: 0.0.40
codegen_flags: <defaults>
</compile_context>

<pallas_src>
import functools

import jax
import jax.numpy as jnp
from jax.experimental import pallas as pl
from jax.experimental.pallas import tpu as pltpu

MARGIN = 0.3


def _round_up(a, b):
    return ((a + b - 1) // b) * b


def _triplet_kernel(xa_ref, xc_ref, sqa_ref, sqc_ref, laba_ref, labc_ref, cpad_ref,
                    out_ref, ap2_sc, an2_sc, *, margin):
    # xa_ref:   (TM, Dp)  anchor-row tile of the embeddings (f32 or bf16)
    # xc_ref:   (TN, Dp)  candidate-row tile of the embeddings (f32 or bf16)
    # sqa_ref:  (TM, 1)   f32 anchor squared norms (precomputed)
    # sqc_ref:  (1,  TN)  f32 candidate squared norms (precomputed)
    # laba_ref: (TM, 1)   i32 anchor labels (-1 = padding)
    # labc_ref: (1,  TN)  i32 candidate labels (-1 = padding)
    # cpad_ref: (1,  TN)  f32 column-padding bias (+1e30 on padded columns)
    # out_ref:  (TM, 1)   f32 per-anchor loss (written at the last column step)
    # ap2_sc / an2_sc: (TM, 1) f32 running hardest-pos / hardest-neg squared dists
    j = pl.program_id(1)

    @pl.when(j == 0)
    def _init():
        ap2_sc[...] = jnp.full_like(ap2_sc, -1e30)
        an2_sc[...] = jnp.full_like(an2_sc, 1e30)

    # Squared pairwise distances for this (TM, TN) tile: ||a||^2 + ||c||^2 - 2 a.c
    gram = jnp.einsum('md,nd->mn', xa_ref[...], xc_ref[...],
                      preferred_element_type=jnp.float32)          # MXU, (TM, TN)
    d2 = sqa_ref[...] + sqc_ref[...] - 2.0 * gram                   # (TM, TN) f32

    same = laba_ref[...] == labc_ref[...]                           # (TM, TN)
    # Hardest positive: real anchors (label >= 0) never match padded columns (-1).
    ap2_sc[...] = jnp.maximum(
        ap2_sc[...],
        jnp.max(jnp.where(same, d2, -1e30), axis=1, keepdims=True))
    # Hardest negative: padded columns are pushed out via the precomputed bias.
    an2_sc[...] = jnp.minimum(
        an2_sc[...],
        jnp.min(jnp.where(same, 1e30, d2 + cpad_ref[...]), axis=1, keepdims=True))

    @pl.when(j == pl.num_programs(1) - 1)
    def _finalize():
        # sqrt only the 2*TM selected values; clamp matches clamp(min=1e-12).sqrt().
        ap = jnp.sqrt(jnp.maximum(ap2_sc[...], 1e-12))
        an = jnp.sqrt(jnp.maximum(an2_sc[...], 1e-12))
        out_ref[...] = jnp.maximum(ap - an + margin, 0.0)


def _choose_tiles(n, dp, elt_bytes, tm_max, tn_max, budget=20 * 1024 * 1024):
    """Power-of-two tiles (sublane/lane aligned) sized for a v7x-safe VMEM budget."""
    tm = int(min(tm_max, max(8, pl.next_power_of_2(n))))
    tn = int(min(tn_max, max(128, pl.next_power_of_2(n))))

    def footprint(tm_, tn_):
        # double-buffered x tiles + d2/mask temporaries (dominant terms)
        return 2 * (tm_ + tn_) * dp * elt_bytes + 4 * tm_ * tn_

    while tn > 128 and footprint(tm, tn) > budget:
        tn //= 2
    while tm > 8 and footprint(tm, tn) > budget:
        tm //= 2
    return tm, tn


def dual_loss(x, target, *, margin=MARGIN, use_bf16_gram=False,
              tm_max=256, tn_max=512):
    """x: (N, D) float embeddings; target: (N,) int labels (>= 0) -> scalar f32 loss."""
    n, d = x.shape
    x = x.astype(jnp.float32)
    target = target.astype(jnp.int32)

    dp = _round_up(max(d, 1), 128)                    # lane-friendly K depth
    elt = 2 if use_bf16_gram else 4
    tm, tn = _choose_tiles(n, dp, elt, tm_max, tn_max)
    np_ = _round_up(n, max(tm, tn))                   # divisible by both tiles

    # Pad once; padded rows are zero vectors with label -1.
    xp = jnp.zeros((np_, dp), jnp.float32).at[:n, :d].set(x)
    sq = jnp.sum(xp * xp, axis=1)                     # (Np,) f32, hoisted norms
    sqa = sq.reshape(np_, 1)
    sqc = sq.reshape(1, np_)
    lab = jnp.full((np_,), -1, jnp.int32).at[:n].set(target)
    laba = lab.reshape(np_, 1)
    labc = lab.reshape(1, np_)
    cpad = jnp.where(labc < 0, 1e30, 0.0).astype(jnp.float32)   # (1, Np) neg-side bias

    x_in = xp.astype(jnp.bfloat16) if use_bf16_gram else xp     # no transpose copy

    grid = (np_ // tm, np_ // tn)

    # Explicit VMEM limit sized from the actual buffer footprint (with headroom).
    est = (2 * (tm + tn) * dp * elt          # double-buffered embedding tiles
           + 2 * (2 * tm + 3 * tn) * 4       # norms / labels / bias blocks
           + 2 * tm * 4                      # output block
           + 2 * tm * 4 * 2                  # ap2/an2 scratch
           + 8 * tm * tn)                    # d2 / mask temporaries
    vmem_limit = int(min(max(32 * 1024 * 1024, 2 * est), 48 * 1024 * 1024))

    kernel = functools.partial(_triplet_kernel, margin=float(margin))
    per_anchor = pl.pallas_call(
        kernel,
        out_shape=jax.ShapeDtypeStruct((np_, 1), jnp.float32),
        grid_spec=pltpu.PrefetchScalarGridSpec(
            num_scalar_prefetch=0,
            grid=grid,
            in_specs=[
                pl.BlockSpec((tm, dp), lambda i, j: (i, 0)),   # anchor rows
                pl.BlockSpec((tn, dp), lambda i, j: (j, 0)),   # candidate rows
                pl.BlockSpec((tm, 1), lambda i, j: (i, 0)),    # anchor norms
                pl.BlockSpec((1, tn), lambda i, j: (0, j)),    # candidate norms
                pl.BlockSpec((tm, 1), lambda i, j: (i, 0)),    # anchor labels
                pl.BlockSpec((1, tn), lambda i, j: (0, j)),    # candidate labels
                pl.BlockSpec((1, tn), lambda i, j: (0, j)),    # column-pad bias
            ],
            out_specs=pl.BlockSpec((tm, 1), lambda i, j: (i, 0)),
            scratch_shapes=[pltpu.VMEM((tm, 1), jnp.float32),
                            pltpu.VMEM((tm, 1), jnp.float32)],
        ),
        compiler_params=pltpu.CompilerParams(
            # row tiles are independent (sharded across TCs on v7x);
            # column (reduction) axis is sequential and last.
            dimension_semantics=("parallel", "arbitrary"),
            vmem_limit_bytes=vmem_limit,
        ),
    )(x_in, x_in, sqa, sqc, laba, labc, cpad)

    return jnp.mean(per_anchor[:n, 0])


def _reference(x, target, margin=MARGIN):
    """Pure-JAX reference mirroring the PyTorch TripletLoss (batch-hard)."""
    x = x.astype(jnp.float32)
    sq = jnp.sum(x * x, axis=1, keepdims=True)
    gram = jnp.dot(x, x.T, precision=jax.lax.Precision.HIGHEST)
    dist = jnp.sqrt(jnp.maximum(sq + sq.T - 2.0 * gram, 1e-12))
    same = target[:, None] == target[None, :]
    ap = jnp.max(jnp.where(same, dist, -jnp.inf), axis=1)
    an = jnp.min(jnp.where(same, jnp.inf, dist), axis=1)
    return jnp.mean(jnp.maximum(ap - an + margin, 0.0))


if __name__ == "__main__":
    key = jax.random.PRNGKey(0)
    k1, k2 = jax.random.split(key)

    # TODO(synk): nn.CrossEntropyLoss (self.xentl) is constructed in __init__ but
    # never used in forward, so it is intentionally not implemented.

    # Test 1: tiny deterministic batch (single column tile, several row tiles).
    n1, d1 = 16, 32
    x1 = jax.random.normal(k1, (n1, d1), dtype=jnp.float32)
    t1 = jnp.array([0, 0, 1, 1, 2, 2, 3, 3, 0, 1, 2, 3, 0, 1, 2, 3], dtype=jnp.int32)
    got1 = dual_loss(x1, t1)
    jax.block_until_ready(got1)
    ref1 = _reference(x1, t1)
    assert jnp.allclose(got1, ref1, rtol=2e-3, atol=2e-3), (got1, ref1)

    # Test 2: multi-tile on both grid axes (3 row tiles x 3 column tiles),
    # exercising the online hardest-pos/neg accumulation across column steps.
    n2, d2 = 384, 160
    x2 = jax.random.normal(k2, (n2, d2), dtype=jnp.float32)
    t2 = (jnp.arange(n2) % 8).astype(jnp.int32)
    got2 = dual_loss(x2, t2, tm_max=128, tn_max=128)
    jax.block_until_ready(got2)
    ref2 = _reference(x2, t2)
    assert jnp.allclose(got2, ref2, rtol=2e-3, atol=2e-3), (got2, ref2)

    # Optional bf16-gram fast path (MXU-native); looser tolerance by design.
    got2_bf16 = dual_loss(x2, t2, tm_max=128, tn_max=128, use_bf16_gram=True)
    jax.block_until_ready(got2_bf16)
    assert jnp.allclose(got2_bf16, ref2, rtol=0.15, atol=0.15), (got2_bf16, ref2)

    print("KERNEL_OK")
</pallas_src>

<mosaic_0001>
module attributes {stable_mosaic.version = 11 : i64} {
  func.func @_triplet_kernel(%arg0: i32, %arg1: i32, %arg2: memref<16x128xf32, #tpu.memory_space<vmem>>, %arg3: memref<128x128xf32, #tpu.memory_space<vmem>>, %arg4: memref<16x1xf32, #tpu.memory_space<vmem>>, %arg5: memref<1x128xf32, #tpu.memory_space<vmem>>, %arg6: memref<16x1xi32, #tpu.memory_space<vmem>>, %arg7: memref<1x128xi32, #tpu.memory_space<vmem>>, %arg8: memref<1x128xf32, #tpu.memory_space<vmem>>, %arg9: memref<16x1xf32, #tpu.memory_space<vmem>>, %arg10: memref<16x1xf32, #tpu.memory_space<vmem>>, %arg11: memref<16x1xf32, #tpu.memory_space<vmem>>) attributes {dimension_semantics = [#tpu.dimension_semantics<parallel>, #tpu.dimension_semantics<arbitrary>], iteration_bounds = array<i64: 8, 1>, scalar_prefetch = 0 : i64, scratch_operands = 2 : i64, tpu.core_type = #tpu.core_type<tc>, window_params = [{transform_indices = @transform_0, window_bounds = array<i64: 16, 128>}, {transform_indices = @transform_1, window_bounds = array<i64: 128, 128>}, {transform_indices = @transform_2, window_bounds = array<i64: 16, 1>}, {transform_indices = @transform_3, window_bounds = array<i64: 1, 128>}, {transform_indices = @transform_4, window_bounds = array<i64: 16, 1>}, {transform_indices = @transform_5, window_bounds = array<i64: 1, 128>}, {transform_indices = @transform_6, window_bounds = array<i64: 1, 128>}, {transform_indices = @transform_7, window_bounds = array<i64: 16, 1>}]} {
    %c0_i32 = arith.constant 0 : i32
    %0 = arith.cmpi eq, %arg1, %c0_i32 : i32
    %1 = arith.extui %0 : i1 to i32
    %c0_i32_0 = arith.constant 0 : i32
    %2 = arith.cmpi ne, %1, %c0_i32_0 : i32
    scf.if %2 {
      %cst_29 = arith.constant -1.000000e+30 : f32
      %39 = vector.broadcast %cst_29 : f32 to vector<16x1xf32>
      %c0_30 = arith.constant 0 : index
      %c0_31 = arith.constant 0 : index
      %40 = vector.load %arg10[%c0_30, %c0_31] : memref<16x1xf32, #tpu.memory_space<vmem>>, vector<16x1xf32>
      tpu.vector_store %arg10[%c0_30, %c0_31], %39 {strides = array<i32>} : memref<16x1xf32, #tpu.memory_space<vmem>>, vector<16x1xf32>,
      %cst_32 = arith.constant 1.000000e+30 : f32
      %41 = vector.broadcast %cst_32 : f32 to vector<16x1xf32>
      %c0_33 = arith.constant 0 : index
      %c0_34 = arith.constant 0 : index
      %42 = vector.load %arg11[%c0_33, %c0_34] : memref<16x1xf32, #tpu.memory_space<vmem>>, vector<16x1xf32>
      tpu.vector_store %arg11[%c0_33, %c0_34], %41 {strides = array<i32>} : memref<16x1xf32, #tpu.memory_space<vmem>>, vector<16x1xf32>,
    } else {
    }
    %c0 = arith.constant 0 : index
    %c0_1 = arith.constant 0 : index
    %3 = vector.load %arg2[%c0, %c0_1] : memref<16x128xf32, #tpu.memory_space<vmem>>, vector<16x128xf32>
    %c0_2 = arith.constant 0 : index
    %c0_3 = arith.constant 0 : index
    %4 = vector.load %arg3[%c0_2, %c0_3] : memref<128x128xf32, #tpu.memory_space<vmem>>, vector<128x128xf32>
    "tpu.trace_start"() <{level = 10 : i32, message = "md,nd->mn"}> : () -> ()
    %cst = arith.constant dense<0.000000e+00> : vector<16x128xf32>
    %5 = tpu.matmul %3, %4, %cst {dimension_numbers = #tpu.dot_dimension_numbers<[1], [1], [0], [0], [0, 0, 1, 0], [], []>} : vector<16x128xf32>, vector<128x128xf32>, vector<16x128xf32> -> vector<16x128xf32>
    "tpu.trace_stop"() : () -> ()
    %c0_4 = arith.constant 0 : index
    %c0_5 = arith.constant 0 : index
    %6 = vector.load %arg4[%c0_4, %c0_5] : memref<16x1xf32, #tpu.memory_space<vmem>>, vector<16x1xf32>
    %c0_6 = arith.constant 0 : index
    %c0_7 = arith.constant 0 : index
    %7 = vector.load %arg5[%c0_6, %c0_7] : memref<1x128xf32, #tpu.memory_space<vmem>>, vector<1x128xf32>
    %8 = vector.broadcast %6 : vector<16x1xf32> to vector<16x128xf32>
    %9 = vector.broadcast %7 : vector<1x128xf32> to vector<16x128xf32>
    %10 = arith.addf %8, %9 : vector<16x128xf32>
    %cst_8 = arith.constant 2.000000e+00 : f32
    %11 = vector.broadcast %cst_8 : f32 to vector<16x128xf32>
    %12 = arith.mulf %11, %5 : vector<16x128xf32>
    %13 = arith.subf %10, %12 : vector<16x128xf32>
    %c0_9 = arith.constant 0 : index
    %c0_10 = arith.constant 0 : index
    %14 = vector.load %arg6[%c0_9, %c0_10] : memref<16x1xi32, #tpu.memory_space<vmem>>, vector<16x1xi32>
    %c0_11 = arith.constant 0 : index
    %c0_12 = arith.constant 0 : index
    %15 = vector.load %arg7[%c0_11, %c0_12] : memref<1x128xi32, #tpu.memory_space<vmem>>, vector<1x128xi32>
    %16 = vector.broadcast %14 : vector<16x1xi32> to vector<16x128xi32>
    %17 = vector.broadcast %15 : vector<1x128xi32> to vector<16x128xi32>
    %18 = arith.cmpi eq, %16, %17 : vector<16x128xi32>
    %c0_13 = arith.constant 0 : index
    %c0_14 = arith.constant 0 : index
    %19 = vector.load %arg10[%c0_13, %c0_14] : memref<16x1xf32, #tpu.memory_space<vmem>>, vector<16x1xf32>
    %cst_15 = arith.constant -1.000000e+30 : f32
    %20 = vector.broadcast %cst_15 : f32 to vector<16x128xf32>
    %21 = arith.select %18, %13, %20 : vector<16x128xi1>, vector<16x128xf32>
    %cst_16 = arith.constant dense<0xFF800000> : vector<16xf32>
    %22 = vector.multi_reduction <maximumf>, %21, %cst_16 [1] : vector<16x128xf32> to vector<16xf32>
    %23 = vector.shape_cast %22 : vector<16xf32> to vector<16x1xf32>
    %24 = arith.maximumf %19, %23 : vector<16x1xf32>
    %c0_17 = arith.constant 0 : index
    %c0_18 = arith.constant 0 : index
    %25 = vector.load %arg10[%c0_17, %c0_18] : memref<16x1xf32, #tpu.memory_space<vmem>>, vector<16x1xf32>
    tpu.vector_store %arg10[%c0_17, %c0_18], %24 {strides = array<i32>} : memref<16x1xf32, #tpu.memory_space<vmem>>, vector<16x1xf32>,
    %c0_19 = arith.constant 0 : index
    %c0_20 = arith.constant 0 : index
    %26 = vector.load %arg11[%c0_19, %c0_20] : memref<16x1xf32, #tpu.memory_space<vmem>>, vector<16x1xf32>
    %c0_21 = arith.constant 0 : index
    %c0_22 = arith.constant 0 : index
    %27 = vector.load %arg8[%c0_21, %c0_22] : memref<1x128xf32, #tpu.memory_space<vmem>>, vector<1x128xf32>
    %28 = vector.broadcast %27 : vector<1x128xf32> to vector<16x128xf32>
    %29 = arith.addf %13, %28 : vector<16x128xf32>
    %cst_23 = arith.constant 1.000000e+30 : f32
    %30 = vector.broadcast %cst_23 : f32 to vector<16x128xf32>
    %31 = arith.select %18, %30, %29 : vector<16x128xi1>, vector<16x128xf32>
    %cst_24 = arith.constant dense<0x7F800000> : vector<16xf32>
    %32 = vector.multi_reduction <minimumf>, %31, %cst_24 [1] : vector<16x128xf32> to vector<16xf32>
    %33 = vector.shape_cast %32 : vector<16xf32> to vector<16x1xf32>
    %34 = arith.minimumf %26, %33 : vector<16x1xf32>
    %c0_25 = arith.constant 0 : index
    %c0_26 = arith.constant 0 : index
    %35 = vector.load %arg11[%c0_25, %c0_26] : memref<16x1xf32, #tpu.memory_space<vmem>>, vector<16x1xf32>
    tpu.vector_store %arg11[%c0_25, %c0_26], %34 {strides = array<i32>} : memref<16x1xf32, #tpu.memory_space<vmem>>, vector<16x1xf32>,
    %c0_i32_27 = arith.constant 0 : i32
    %36 = arith.cmpi eq, %arg1, %c0_i32_27 : i32
    %37 = arith.extui %36 : i1 to i32
    %c0_i32_28 = arith.constant 0 : i32
    %38 = arith.cmpi ne, %37, %c0_i32_28 : i32
    scf.if %38 {
      %c0_29 = arith.constant 0 : index
      %c0_30 = arith.constant 0 : index
      %39 = vector.load %arg10[%c0_29, %c0_30] : memref<16x1xf32, #tpu.memory_space<vmem>>, vector<16x1xf32>
      %cst_31 = arith.constant 9.99999996E-13 : f32
      %40 = vector.broadcast %cst_31 : f32 to vector<16x1xf32>
      %41 = arith.maximumf %39, %40 : vector<16x1xf32>
      %42 = math.sqrt %41 : vector<16x1xf32>
      %c0_32 = arith.constant 0 : index
      %c0_33 = arith.constant 0 : index
      %43 = vector.load %arg11[%c0_32, %c0_33] : memref<16x1xf32, #tpu.memory_space<vmem>>, vector<16x1xf32>
      %cst_34 = arith.constant 9.99999996E-13 : f32
      %44 = vector.broadcast %cst_34 : f32 to vector<16x1xf32>
      %45 = arith.maximumf %43, %44 : vector<16x1xf32>
      %46 = math.sqrt %45 : vector<16x1xf32>
      %47 = arith.subf %42, %46 : vector<16x1xf32>
      %cst_35 = arith.constant 3.000000e-01 : f32
      %48 = vector.broadcast %cst_35 : f32 to vector<16x1xf32>
      %49 = arith.addf %47, %48 : vector<16x1xf32>
      %cst_36 = arith.constant 0.000000e+00 : f32
      %50 = vector.broadcast %cst_36 : f32 to vector<16x1xf32>
      %51 = arith.maximumf %49, %50 : vector<16x1xf32>
      %c0_37 = arith.constant 0 : index
      %c0_38 = arith.constant 0 : index
      %52 = vector.load %arg9[%c0_37, %c0_38] : memref<16x1xf32, #tpu.memory_space<vmem>>, vector<16x1xf32>
      tpu.vector_store %arg9[%c0_37, %c0_38], %51 {strides = array<i32>} : memref<16x1xf32, #tpu.memory_space<vmem>>, vector<16x1xf32>,
    } else {
    }
    return
  }
  func.func @transform_0(%arg0: i32, %arg1: i32) -> (i32, i32) {
    %c0_i32 = arith.constant 0 : i32
    %c0_i32_0 = arith.constant 0 : i32
    return %arg0, %c0_i32 : i32, i32
  }
  func.func @transform_1(%arg0: i32, %arg1: i32) -> (i32, i32) {
    %c0_i32 = arith.constant 0 : i32
    %c0_i32_0 = arith.constant 0 : i32
    return %arg1, %c0_i32 : i32, i32
  }
  func.func @transform_2(%arg0: i32, %arg1: i32) -> (i32, i32) {
    %c0_i32 = arith.constant 0 : i32
    %c0_i32_0 = arith.constant 0 : i32
    return %arg0, %c0_i32 : i32, i32
  }
  func.func @transform_3(%arg0: i32, %arg1: i32) -> (i32, i32) {
    %c0_i32 = arith.constant 0 : i32
    %c0_i32_0 = arith.constant 0 : i32
    return %c0_i32, %arg1 : i32, i32
  }
  func.func @transform_4(%arg0: i32, %arg1: i32) -> (i32, i32) {
    %c0_i32 = arith.constant 0 : i32
    %c0_i32_0 = arith.constant 0 : i32
    return %arg0, %c0_i32 : i32, i32
  }
  func.func @transform_5(%arg0: i32, %arg1: i32) -> (i32, i32) {
    %c0_i32 = arith.constant 0 : i32
    %c0_i32_0 = arith.constant 0 : i32
    return %c0_i32, %arg1 : i32, i32
  }
  func.func @transform_6(%arg0: i32, %arg1: i32) -> (i32, i32) {
    %c0_i32 = arith.constant 0 : i32
    %c0_i32_0 = arith.constant 0 : i32
    return %c0_i32, %arg1 : i32, i32
  }
  func.func @transform_7(%arg0: i32, %arg1: i32) -> (i32, i32) {
    %c0_i32 = arith.constant 0 : i32
    %c0_i32_0 = arith.constant 0 : i32
    return %arg0, %c0_i32 : i32, i32
  }
}

</mosaic_0001>

<bundles_post_ra>
// kernel: tpu_custom_call.1
= control target key start
LH: loop header
LB: loop body
LE: loop exit
PB: predicated region body
PF: predicated region fallthrough
CT: control target
= control target key end

     0   :  { %s976_s24 = smov 0   ;;  %s978_s25 = smov 0   ;;  %s1092_s0 = inlined_call_operand.vmem [shape: f32[128,128], index: 0, kind: input, shape index: {}]   ;;  %s1093_s1 = inlined_call_operand.vmem [shape: f32[128,128], index: 1, kind: input, shape index: {}]   ;;  %s1094_s2 = inlined_call_operand.vmem [shape: f32[128,1], index: 2, kind: input, shape index: {}]   ;;  %s1095_s3 = inlined_call_operand.vmem [shape: f32[1,128], index: 3, kind: input, shape index: {}]   ;;  %s1096_s4 = inlined_call_operand.vmem [shape: s32[128,1], index: 4, kind: input, shape index: {}]   ;;  %s1097_s5 = inlined_call_operand.vmem [shape: s32[1,128], index: 5, kind: input, shape index: {}]   ;;  %s1098_s6 = inlined_call_operand.vmem [shape: f32[1,128], index: 6, kind: input, shape index: {}]   ;;  %s1099_s7 = inlined_call_operand.vmem [shape: f32[128,1], index: 7, kind: output, shape index: {}]  }
   0x1   :  { %s980_s26 = smov 0  }
   0x2 LB: > { %s29_s27 = sadd.s32 1, %s927_s25  ;;  %p773_p0 = scmp.ge.s32.totalorder %s931_s26, 1  ;;  %s931_s26 = sphi %s980_s26, %s17_s26   ;;  %s927_s25 = sphi %s978_s25, %s1101_s25   ;;  %s923_s24 = sphi %s976_s24, %s1100_s24  }
   0x3   : > { %p31_p1 = scmp.ge.s32.totalorder %s29_s27, 8  ;;  %p307_p2 = scmp.lt.s32.totalorder %s931_s26, 9 }
   0x5   : > { %s1103_s27 = smov (%p31_p1, %s29_s27), 0  ;;  %p308_p3 = pnand %p773_p0, %p307_p2 }
   0x6   : > { %v413_v0 = vld [vmem:[%s1093_s1] sm:$0xff] (!%p308_p3)  ;;  %v414_v1 = vld [vmem:[%s1093_s1 + $0x8] sm:$0xff] (!%p308_p3)  ;;  %v415_v2 = vld [vmem:[%s1093_s1 + $0x10] sm:$0xff] (!%p308_p3)  ;;  %s774_s11 = sshll.u32 (!%p308_p3), %s923_s24, 1  ;;  %v933_v5 = vmov (!%p308_p3), 0   ;;  %vm406_vm0 = vcmask (!%p308_p3), 7168  }
   0x7   : > { %311 = sbr.rel (%p308_p3) target bundleno = 475 (0x1db), region = 48  ;;  %v840_v3 = vpack.c.bf16 (!%p308_p3), %v414_v1, %v413_v0  ;;  %v416_v4 = vld [vmem:[%s1093_s1 + $0x18] sm:$0xff] (!%p308_p3)  ;;  %p364_p4 = scmp.lt.s32.totalorder (!%p308_p3), %s774_s11, 15  ;;  %899 = vset.pattern.permute.xlu0 (!%p308_p3), %v933_v5  ;;  %900 = vset.pattern.permute.xlu1 (!%p308_p3), %v933_v5  ;;  %v417_v7 = vld [vmem:[%s1093_s1 + $0x20] sm:$0xff] (!%p308_p3)  ;;  %v418_v8 = vld [vmem:[%s1093_s1 + $0x28] sm:$0xff] (!%p308_p3) }
   0x8   : > { %v844_v6 = vpack.c.bf16 (!%p308_p3), %v416_v4, %v415_v2  ;;  %v848_v12 = vpack.c.bf16 (!%p308_p3), %v418_v8, %v417_v7  ;;  %v419_v15 = vld [vmem:[%s1093_s1 + $0x30] sm:$0xff] (!%p308_p3)  ;;  %v420_v16 = vld [vmem:[%s1093_s1 + $0x38] sm:$0xff] (!%p308_p3)  ;;  %v421_v18 = vld [vmem:[%s1093_s1 + $0x40] sm:$0xff] (!%p308_p3)  ;;  %v934_v31 = vmov (!%p308_p3), -1e+30  }
   0x9   : > { %841 = vmatprep.subr.bf16.mxu0 (!%p308_p3), %v840_v3  ;;  %v852_v17 = vpack.c.bf16 (!%p308_p3), %v420_v16, %v419_v15  ;;  %v422_v19 = vld [vmem:[%s1093_s1 + $0x48] sm:$0xff] (!%p308_p3)  ;;  %v423_v21 = vld [vmem:[%s1093_s1 + $0x50] sm:$0xff] (!%p308_p3)  ;;  %v424_v22 = vld [vmem:[%s1093_s1 + $0x58] sm:$0xff] (!%p308_p3)  ;;  %408 = vst.msk [vmem:[#allocation2 + $0x8] sm:$0xff] (!%p308_p3), %vm406_vm0, %v934_v31  ;;  %v935_v53 = vmov (!%p308_p3), 1e+30  }
   0xa   : > { %843 = vmatpush3.bf16.xpose.msra.mxu0 (!%p308_p3), %v840_v3  ;;  %v856_v20 = vpack.c.bf16 (!%p308_p3), %v422_v19, %v421_v18  ;;  %v860_v23 = vpack.c.bf16 (!%p308_p3), %v424_v22, %v423_v21  ;;  %v425_v24 = vld [vmem:[%s1093_s1 + $0x60] sm:$0xff] (!%p308_p3)  ;;  %v426_v25 = vld [vmem:[%s1093_s1 + $0x68] sm:$0xff] (!%p308_p3)  ;;  %v427_v27 = vld [vmem:[%s1093_s1 + $0x70] sm:$0xff] (!%p308_p3)  ;;  %407 = vst.msk [vmem:[#allocation2] sm:$0xff] (!%p308_p3), %vm406_vm0, %v934_v31 }
   0xb   : > { %845 = vmatprep.subr.bf16.mxu0 (!%p308_p3), %v844_v6  ;;  %v864_v26 = vpack.c.bf16 (!%p308_p3), %v426_v25, %v425_v24  ;;  %v428_v28 = vld [vmem:[%s1093_s1 + $0x78] sm:$0xff] (!%p308_p3)  ;;  %v782_v34 = vld [vmem:[%s1095_s3] ss:$0 sm:$0xff] (!%p308_p3)  ;;  %409 = vst.msk [vmem:[#allocation3] sm:$0xff] (!%p308_p3), %vm406_vm0, %v935_v53  ;;  %410 = vst.msk [vmem:[#allocation3 + $0x8] sm:$0xff] (!%p308_p3), %vm406_vm0, %v935_v53 }
   0xc   : > { %v868_v29 = vpack.c.bf16 (!%p308_p3), %v428_v28, %v427_v27  ;;  %v783_v36 = vld [vmem:[%s1097_s5] ss:$0 sm:$0xff] (!%p308_p3) }
   0xd   : > { %v784_v45 = vld [vmem:[%s1098_s6] ss:$0 sm:$0xff] (!%p308_p3) }
   0xe   : > { %s1105_s11 = smov (!%p364_p4, %s774_s11), 15 }
   0xf   : > { %s1006_s14 = sshll.u32 %s1105_s11, 3 }
  0x10   : > { %s1018_s21 = scalar_lea.vmem %s1092_s0, %s1006_s14  ;;  %s379_s24 = scalar_lea.vmem %s1094_s2, %s1006_s14  ;;  %v545_v54 = vld [vmem:[#allocation2 + $0x8] sm:$0xff] }
  0x11   : > { %v411_v9 = vld [vmem:[%s1018_s21] sm:$0xff]  ;;  %s388_s30 = scalar_lea.vmem %s1096_s4, %s1006_s14  ;;  %v505_v13 = vld [vmem:[%s379_s24 + $0x8] sm:$0xff]  ;;  %s400_s18 = scalar_lea.vmem %s1099_s7, %s1006_s14 }
  0x12   : > { %837 = vmatprep.mubr.f32.mxu0 %v411_v9  ;;  %v504_v10 = vld [vmem:[%s379_s24] sm:$0xff]  ;;  %v530_v14 = vld [vmem:[%s388_s30 + $0x8] sm:$0xff]  ;;  %847 = vmatpush3.bf16.xpose.msra.mxu0 %v844_v6  ;;  %v557_v60 = vld [vmem:[#allocation3] sm:$0xff] }
  0x13   : > { %v529_v11 = vld [vmem:[%s388_s30] sm:$0xff]  ;;  %509 = vperm.xlu0 %899, %v504_v10   ;;  %849 = vmatprep.subr.bf16.mxu0 %v848_v12  ;;  %v412_v30 = vld [vmem:[%s1018_s21 + $0x8] sm:$0xff]  ;;  %v558_v63 = vld [vmem:[#allocation3 + $0x8] sm:$0xff] }
  0x14   : > { %533 = vperm.xlu1 %900, %v529_v11   ;;  %v544_v55 = vld [vmem:[#allocation2] sm:$0xff] }
  0x17   : > { %514 = vperm.xlu0 %899, %v505_v13  }
  0x18   : > { %536 = vperm.xlu1 %900, %v530_v14  }
  0x1a   : > { %851 = vmatpush3.bf16.xpose.msra.mxu0 %v848_v12 }
  0x1b   : > { %853 = vmatprep.subr.bf16.mxu0 %v852_v17 }
  0x22   : > { %855 = vmatpush3.bf16.xpose.msra.mxu0 %v852_v17 }
  0x23   : > { %857 = vmatprep.subr.bf16.mxu0 %v856_v20 }
  0x2a   : > { %859 = vmatpush3.bf16.xpose.msra.mxu0 %v856_v20 }
  0x2b   : > { %861 = vmatprep.subr.bf16.mxu0 %v860_v23 }
  0x32   : > { %863 = vmatpush3.bf16.xpose.msra.mxu0 %v860_v23 }
  0x33   : > { %865 = vmatprep.subr.bf16.mxu0 %v864_v26 }
  0x3a   : > { %867 = vmatpush3.bf16.xpose.msra.mxu0 %v864_v26 }
  0x3b   : > { %869 = vmatprep.subr.bf16.mxu0 %v868_v29 }
  0x42   : > { %871 = vmatpush3.bf16.xpose.msra.mxu0 %v868_v29 }
  0x49   : > { %838 = vmatmul.mubr.f32.vlgmr.msra.gmra.mrb[0].mxu0 %v412_v30 }
  0x92   : > { %v510_v32 = vpop.permute.xlu0 %509 }
  0x93   : > { %v534_v33 = vpop.permute.xlu1 %533  ;;  %v523_v39 = vadd.f32 %v782_v34, %v510_v32 }
  0x94   : > { %vm542_vm2 = vcmp.eq.s32.totalorder %v534_v33, %v783_v36 }
  0x96   : > { %v515_v35 = vpop.permute.xlu0 %514 }
  0x97   : > { %v524_v37 = vadd.f32 %v782_v34, %v515_v35  ;;  %v537_v38 = vpop.permute.xlu1 %536 }
  0x98   : > { %vm543_vm1 = vcmp.eq.s32.totalorder %v537_v38, %v783_v36 }
 0x11c   : > { %v839_v40 = vpop.f32.mrb[0].mxu0 }
 0x11d   : > { %v526_v41 = vmul.f32 2.0, %v839_v40  ;;  %v495_v42 = vpop.f32.mrb[1].mxu0 }
 0x11e   : > { %v525_v43 = vmul.f32 2.0, %v495_v42 }
 0x11f   : > { %v528_v44 = vsub.f32 %v524_v37, %v526_v41 }
 0x120   : > { %v527_v46 = vsub.f32 %v523_v39, %v525_v43 }
 0x121   : > { %v547_v47 = vsel %vm543_vm1, %v528_v44, -1e+30  ;;  %v567_v51 = vadd.f32 %v784_v45, %v528_v44 }
 0x122   : > { %550 = vmax.xlane.f32.xlu1 %v547_v47  ;;  %v546_v48 = vsel %vm542_vm2, %v527_v46, -1e+30  ;;  %v566_v49 = vadd.f32 %v784_v45, %v527_v46 }
 0x123   : > { %548 = vmax.xlane.f32.xlu0 %v546_v48  ;;  %v569_v52 = vsel %vm543_vm1, 1e+30, %v567_v51 }
 0x124   : > { %v568_v50 = vsel %vm542_vm2, 1e+30, %v566_v49 }
 0x127   : > { %570 = vmin.xlane.f32.xlu0 %v568_v50 }
 0x12b   : > { %572 = vmin.xlane.f32.xlu0 %v569_v52 }
 0x1af   : > { %v551_v56 = vpop.xlane.xlu1 %550 }
 0x1b0   : > { %v553_v57 = vmax.f32 %v545_v54, %v551_v56  ;;  %v549_v58 = vpop.xlane.xlu0 %548 }
 0x1b1   : > { %v552_v59 = vmax.f32 %v544_v55, %v549_v58 }
 0x1b2   : > { %556 = vst.msk [vmem:[#allocation2 + $0x8] sm:$0xff] %vm406_vm0, %v553_v57 }
 0x1b3   : > { %555 = vst.msk [vmem:[#allocation2] sm:$0xff] %vm406_vm0, %v552_v59 }
 0x1b4   : > { %v571_v61 = vpop.xlane.xlu0 %570 }
 0x1b5   : > { %v574_v62 = vmin.f32 %v557_v60, %v571_v61 }
 0x1b7   : > { %576 = vst.msk [vmem:[#allocation3] sm:$0xff] %vm406_vm0, %v574_v62 }
 0x1b8   : > { %v573_v0 = vpop.xlane.xlu0 %572 }
 0x1b9   : > { %v582_v1 = vld [vmem:[#allocation2 + $0x8] sm:$0xff]  ;;  %v575_v2 = vmin.f32 %v558_v63, %v573_v0 }
 0x1ba   : > { %v581_v3 = vld [vmem:[#allocation2] sm:$0xff]  ;;  %v584_v4 = vmax.f32 %v582_v1, 1e-12 }
 0x1bb   : > { %v583_v5 = vmax.f32 %v581_v3, 1e-12  ;;  %577 = vst.msk [vmem:[#allocation3 + $0x8] sm:$0xff] %vm406_vm0, %v575_v2 }
 0x1bc   : > { %vm594_vm7 = vcmp.eq.f32.partialorder %v584_v4, inf  ;;  %v597_v26 = vand.u32 2147483648, %v584_v4  ;;  %vm596_vm9 = vcmp.eq.f32.partialorder %v584_v4, 0.0 }
 0x1bd   : > { %901 = vrsqrt.f32 %v583_v5  ;;  %vm587_vm3 = vcmp.eq.f32.partialorder %v583_v5, inf  ;;  %v590_v17 = vand.u32 2147483648, %v583_v5  ;;  %vm589_vm5 = vcmp.eq.f32.partialorder %v583_v5, 0.0 }
 0x1be   : > { %v599_v6 = vld [vmem:[#allocation3] sm:$0xff]  ;;  %903 = vrsqrt.f32 %v584_v4 }
 0x1bf   : > { %v601_v7 = vmax.f32 %v599_v6, 1e-12 }
 0x1c1   : > { %905 = vrsqrt.f32 %v601_v7  ;;  %vm605_vm4 = vcmp.eq.f32.partialorder %v601_v7, inf  ;;  %v608_v18 = vand.u32 2147483648, %v601_v7  ;;  %vm607_vm6 = vcmp.eq.f32.partialorder %v601_v7, 0.0 }
 0x1c2   : > { %v600_v8 = vld [vmem:[#allocation3 + $0x8] sm:$0xff] }
 0x1c3   : > { %v602_v9 = vmax.f32 %v600_v8, 1e-12 }
 0x1c5   : > { %907 = vrsqrt.f32 %v602_v9  ;;  %vm612_vm8 = vcmp.eq.f32.partialorder %v602_v9, inf  ;;  %v615_v27 = vand.u32 2147483648, %v602_v9  ;;  %vm614_vm10 = vcmp.eq.f32.partialorder %v602_v9, 0.0 }
 0x1c7   : > { %v902_v10 = vpop.eup %901 }
 0x1c8   : > { %v586_v11 = vmul.f32 %v902_v10, %v583_v5  ;;  %v904_v12 = vpop.eup %903 }
 0x1c9   : > { %v593_v14 = vmul.f32 %v904_v12, %v584_v4 }
 0x1ca   : > { %v588_v15 = vsel %vm587_vm3, %v583_v5, %v586_v11 }
 0x1cb   : > { %v906_v13 = vpop.eup %905  ;;  %v591_v21 = vsel %vm589_vm5, %v590_v17, %v588_v15  ;;  %v595_v23 = vsel %vm594_vm7, %v584_v4, %v593_v14 }
 0x1cc   : > { %v604_v16 = vmul.f32 %v906_v13, %v601_v7  ;;  %v598_v30 = vsel %vm596_vm9, %v597_v26, %v595_v23 }
 0x1ce   : > { %v606_v19 = vsel %vm605_vm4, %v601_v7, %v604_v16 }
 0x1cf   : > { %v908_v20 = vpop.eup %907  ;;  %v609_v22 = vsel %vm607_vm6, %v608_v18, %v606_v19 }
 0x1d0   : > { %v617_v24 = vsub.f32 %v591_v21, %v609_v22  ;;  %v611_v25 = vmul.f32 %v908_v20, %v602_v9 }
 0x1d2   : > { %v619_v28 = vadd.f32 0.3, %v617_v24  ;;  %v613_v29 = vsel %vm612_vm8, %v602_v9, %v611_v25 }
 0x1d3   : > { %v616_v31 = vsel %vm614_vm10, %v615_v27, %v613_v29 }
 0x1d4   : > { %v621_v32 = vmax.f32 %v619_v28, 0.0  ;;  %v618_v33 = vsub.f32 %v598_v30, %v616_v31 }
 0x1d6   : > { %623 = vst.msk [vmem:[%s400_s18] sm:$0xff] %vm406_vm0, %v621_v32  ;;  %v620_v34 = vadd.f32 0.3, %v618_v33 }
 0x1d8   : > { %v622_v35 = vmax.f32 %v620_v34, 0.0 }
 0x1da   : > { %624 = vst.msk [vmem:[%s400_s18 + $0x8] sm:$0xff] %vm406_vm0, %v622_v35 }
 0x1db PF: > { %s17_s26 = sadd.s32 1, %s931_s26   ;;  %s1100_s24 = smov %s927_s25 }
 0x1dc   : > { %p14_p5 = scmp.ge.s32.totalorder %s17_s26, 10   ;;  %s1101_s25 = smov %s1103_s27 }
 0x1de   :  { %16 = sbr.rel (!%p14_p5) target bundleno = 2 (0x2), region = 104 }

</bundles_post_ra>
